<compile_context>
chip_gen: v7x
topology: tpu7x:2x2x1
jax: 0.10.0
libtpu: 0.0.40
codegen_flags: <defaults>
</compile_context>

<pallas_src>
import functools
import math

import jax
import jax.numpy as jnp
from jax.experimental import pallas as pl
from jax.experimental.pallas import tpu as pltpu


def _round_up(x: int, m: int) -> int:
    return -(-x // m) * m


def _layernorm2d_kernel(x_ref, w_ref, b_ref, o_ref, *, eps: float):
    # x_ref: (bb, C, T) block in VMEM; spatial axis is lane-dense (last dim).
    x = x_ref[...].astype(jnp.float32)
    u = jnp.mean(x, axis=1, keepdims=True)           # channel mean (cross-sublane -> XLU)
    d = x - u
    s = jnp.mean(d * d, axis=1, keepdims=True)       # biased variance (matches PyTorch)
    inv = jax.lax.rsqrt(s + eps)                     # EUP rsqrt: separate VLIW slot
    y = d * inv
    w = w_ref[...]                                   # (1, C, 1) -> broadcast along lanes
    b = b_ref[...]
    o_ref[...] = (w * y + b).astype(o_ref.dtype)


def _plan_tiling(B: int, C: int, HW: int, itemsize: int,
                 max_block_bytes: int = 4 * 1024 * 1024):
    """Pick (block_b, t_hw) with dtype/padding-aware VMEM accounting.

    Budget is counted on the *padded* layout: C rounded to the sublane tile for this
    dtype, HW rounded to 128 lanes, so the estimate matches what actually sits in VMEM.
    """
    sub = max(8, 32 // itemsize)               # sublane tile: 8 f32, 16 bf16, 32 int8
    c_pad = _round_up(C, sub)
    col_bytes = c_pad * itemsize               # one lane-column of one batch, padded C
    hw_pad = _round_up(HW, 128)
    slab_bytes = col_bytes * hw_pad            # one batch, full (padded) spatial extent

    if slab_bytes <= max_block_bytes:
        # Whole spatial extent fits in one block; group batches up to the budget.
        t_hw = HW
        block_b = max(1, min(B, max_block_bytes // slab_bytes))
        if B > 1:
            # Guarantee >= 2 batch blocks so both v7x TCs / the DMA pipeline get work.
            block_b = min(block_b, math.ceil(B / 2))
        elif slab_bytes > (1 << 20) and HW >= 256:
            # B == 1, mid-sized tensor: split HW so the grid has >= 2 parallel steps.
            t_hw = min(HW, _round_up(math.ceil(HW / 2), 128))
        return block_b, t_hw, c_pad

    # Single-batch slab exceeds the per-block budget: tile HW, balanced & lane-aligned.
    # (For very large C the 128-lane floor may exceed the nominal budget; the explicit
    #  vmem_limit_bytes below is derived from the *actual* block, so this stays safe.)
    cap = max(128, (max_block_bytes // col_bytes) // 128 * 128)
    n = math.ceil(HW / cap)
    t_hw = min(HW, _round_up(math.ceil(HW / n), 128))
    return 1, t_hw, c_pad


def layernorm2d(x: jax.Array, weight: jax.Array, bias: jax.Array, eps: float = 1e-6) -> jax.Array:
    """x: (B, C, H, W); weight, bias: (C,). Returns same shape/dtype as x."""
    B, C, H, W = x.shape
    HW = H * W
    itemsize = jnp.dtype(x.dtype).itemsize

    x3 = x.reshape(B, C, HW)                          # free reshape on contiguous NCHW
    w3 = weight.reshape(1, C, 1).astype(jnp.float32)
    b3 = bias.reshape(1, C, 1).astype(jnp.float32)

    block_b, t_hw, c_pad = _plan_tiling(B, C, HW, itemsize)
    grid = (pl.cdiv(B, block_b), pl.cdiv(HW, t_hw))

    # Explicit scoped-VMEM limit sized from the actual (padded) block:
    #  double-buffered in + out blocks, plus f32 compute headroom, plus weights/slack.
    t_hw_pad = _round_up(t_hw, 128)
    block_io_bytes = block_b * c_pad * t_hw_pad * itemsize
    block_f32_bytes = block_b * c_pad * t_hw_pad * 4
    vmem_limit = int(max(4 * block_io_bytes + 4 * block_f32_bytes + (2 << 20), 16 << 20))

    cost = pl.CostEstimate(
        flops=int(10 * B * C * HW),
        transcendentals=int(B * HW),
        bytes_accessed=int(2 * B * C * HW * itemsize + 2 * C * 4),
    )

    kernel = functools.partial(_layernorm2d_kernel, eps=float(eps))

    out3 = pl.pallas_call(
        kernel,
        out_shape=jax.ShapeDtypeStruct((B, C, HW), x.dtype),
        grid_spec=pltpu.PrefetchScalarGridSpec(
            num_scalar_prefetch=0,
            grid=grid,
            in_specs=[
                pl.BlockSpec((block_b, C, t_hw), lambda b, s: (b, 0, s)),
                pl.BlockSpec((1, C, 1), lambda b, s: (0, 0, 0)),
                pl.BlockSpec((1, C, 1), lambda b, s: (0, 0, 0)),
            ],
            out_specs=pl.BlockSpec((block_b, C, t_hw), lambda b, s: (b, 0, s)),
        ),
        compiler_params=pltpu.CompilerParams(
            dimension_semantics=("parallel", "parallel"),
            vmem_limit_bytes=vmem_limit,
        ),
        cost_estimate=cost,
    )(x3, w3, b3)

    return out3.reshape(B, C, H, W)


def layernorm2d_ref(x, weight, bias, eps=1e-6):
    xf = x.astype(jnp.float32)
    u = jnp.mean(xf, axis=1, keepdims=True)
    s = jnp.mean((xf - u) ** 2, axis=1, keepdims=True)
    xn = (xf - u) / jnp.sqrt(s + eps)
    return (weight[None, :, None, None] * xn + bias[None, :, None, None]).astype(x.dtype)


if __name__ == "__main__":
    key = jax.random.PRNGKey(0)
    k_x, k_w, k_b, k_x2, k_x3, k_x4 = jax.random.split(key, 6)

    # --- Small test (module-scale shapes; tiny problem, 2 batch grid steps) ---
    B, C, H, W = 2, 4, 16, 16
    x = jax.random.normal(k_x, (B, C, H, W), dtype=jnp.float32)
    weight = 1.0 + 0.1 * jax.random.normal(k_w, (C,), dtype=jnp.float32)
    bias = 0.1 * jax.random.normal(k_b, (C,), dtype=jnp.float32)

    out = jax.block_until_ready(layernorm2d(x, weight, bias, eps=1e-6))
    ref = layernorm2d_ref(x, weight, bias, eps=1e-6)
    assert out.shape == (B, C, H, W) and out.dtype == jnp.float32
    assert jnp.allclose(out, ref, atol=1e-5, rtol=1e-5), "mismatch vs reference (small)"

    # --- Medium test: whole-HW blocks, batch-parallel grid ---
    B2, C2, H2, W2 = 2, 16, 192, 192
    x2 = jax.random.normal(k_x2, (B2, C2, H2, W2), dtype=jnp.float32)
    w2 = 1.0 + 0.05 * jax.random.normal(k_w, (C2,), dtype=jnp.float32)
    b2 = 0.05 * jax.random.normal(k_b, (C2,), dtype=jnp.float32)
    out2 = jax.block_until_ready(layernorm2d(x2, w2, b2, eps=1e-6))
    ref2 = layernorm2d_ref(x2, w2, b2, eps=1e-6)
    assert jnp.allclose(out2, ref2, atol=1e-5, rtol=1e-5), "mismatch vs reference (medium)"

    # --- B == 1 forced-split test: HW split into >= 2 parallel tiles ---
    B3, C3, H3, W3 = 1, 8, 320, 320
    x3 = jax.random.normal(k_x3, (B3, C3, H3, W3), dtype=jnp.float32)
    w3 = jnp.ones((C3,), dtype=jnp.float32)
    b3 = jnp.zeros((C3,), dtype=jnp.float32)
    out3 = jax.block_until_ready(layernorm2d(x3, w3, b3, eps=1e-6))
    ref3 = layernorm2d_ref(x3, w3, b3, eps=1e-6)
    assert jnp.allclose(out3, ref3, atol=1e-5, rtol=1e-5), "mismatch vs reference (split)"

    # --- bf16 I/O test (f32 stats inside the kernel): exercises dtype-aware tiling ---
    B4, C4, H4, W4 = 2, 16, 96, 96
    x4 = jax.random.normal(k_x4, (B4, C4, H4, W4), dtype=jnp.float32).astype(jnp.bfloat16)
    w4 = jnp.ones((C4,), dtype=jnp.float32)
    b4 = jnp.zeros((C4,), dtype=jnp.float32)
    out4 = jax.block_until_ready(layernorm2d(x4, w4, b4, eps=1e-6))
    ref4 = layernorm2d_ref(x4, w4, b4, eps=1e-6)
    assert out4.dtype == jnp.bfloat16
    assert jnp.allclose(out4.astype(jnp.float32), ref4.astype(jnp.float32),
                        atol=3e-2, rtol=3e-2), "mismatch vs reference (bf16)"

    print("KERNEL_OK")
</pallas_src>

<mosaic_0001>
module attributes {stable_mosaic.version = 11 : i64} {
  func.func @_layernorm2d_kernel(%arg0: i32, %arg1: i32, %arg2: memref<1x4x256xf32, #tpu.memory_space<vmem>>, %arg3: memref<1x4x1xf32, #tpu.memory_space<vmem>>, %arg4: memref<1x4x1xf32, #tpu.memory_space<vmem>>, %arg5: memref<1x4x256xf32, #tpu.memory_space<vmem>>) attributes {dimension_semantics = [#tpu.dimension_semantics<parallel>, #tpu.dimension_semantics<parallel>], iteration_bounds = array<i64: 2, 1>, scalar_prefetch = 0 : i64, scratch_operands = 0 : i64, tpu.core_type = #tpu.core_type<tc>, window_params = [{transform_indices = @transform_0, window_bounds = array<i64: 1, 4, 256>}, {pipeline_mode = #tpu.pipeline_mode<synchronous>, transform_indices = @transform_1, window_bounds = array<i64: 1, 4, 1>}, {pipeline_mode = #tpu.pipeline_mode<synchronous>, transform_indices = @transform_2, window_bounds = array<i64: 1, 4, 1>}, {transform_indices = @transform_3, window_bounds = array<i64: 1, 4, 256>}]} {
    %c0 = arith.constant 0 : index
    %c0_0 = arith.constant 0 : index
    %c0_1 = arith.constant 0 : index
    %0 = vector.load %arg2[%c0, %c0_0, %c0_1] : memref<1x4x256xf32, #tpu.memory_space<vmem>>, vector<1x4x256xf32>
    %cst = arith.constant dense<0.000000e+00> : vector<1x256xf32>
    %1 = vector.multi_reduction <add>, %0, %cst [1] : vector<1x4x256xf32> to vector<1x256xf32>
    %2 = vector.shape_cast %1 : vector<1x256xf32> to vector<1x1x256xf32>
    %cst_2 = arith.constant 4.000000e+00 : f32
    %3 = vector.broadcast %cst_2 : f32 to vector<1x1x256xf32>
    %4 = arith.divf %2, %3 : vector<1x1x256xf32>
    %5 = vector.broadcast %4 : vector<1x1x256xf32> to vector<1x4x256xf32>
    %6 = arith.subf %0, %5 : vector<1x4x256xf32>
    %7 = arith.mulf %6, %6 : vector<1x4x256xf32>
    %cst_3 = arith.constant dense<0.000000e+00> : vector<1x256xf32>
    %8 = vector.multi_reduction <add>, %7, %cst_3 [1] : vector<1x4x256xf32> to vector<1x256xf32>
    %9 = vector.shape_cast %8 : vector<1x256xf32> to vector<1x1x256xf32>
    %cst_4 = arith.constant 4.000000e+00 : f32
    %10 = vector.broadcast %cst_4 : f32 to vector<1x1x256xf32>
    %11 = arith.divf %9, %10 : vector<1x1x256xf32>
    %cst_5 = arith.constant 9.99999997E-7 : f32
    %12 = vector.broadcast %cst_5 : f32 to vector<1x1x256xf32>
    %13 = arith.addf %11, %12 : vector<1x1x256xf32>
    %14 = math.rsqrt %13 : vector<1x1x256xf32>
    %15 = vector.broadcast %14 : vector<1x1x256xf32> to vector<1x4x256xf32>
    %16 = arith.mulf %6, %15 : vector<1x4x256xf32>
    %c0_6 = arith.constant 0 : index
    %c0_7 = arith.constant 0 : index
    %c0_8 = arith.constant 0 : index
    %17 = vector.load %arg3[%c0_6, %c0_7, %c0_8] : memref<1x4x1xf32, #tpu.memory_space<vmem>>, vector<1x4x1xf32>
    %c0_9 = arith.constant 0 : index
    %c0_10 = arith.constant 0 : index
    %c0_11 = arith.constant 0 : index
    %18 = vector.load %arg4[%c0_9, %c0_10, %c0_11] : memref<1x4x1xf32, #tpu.memory_space<vmem>>, vector<1x4x1xf32>
    %19 = vector.broadcast %17 : vector<1x4x1xf32> to vector<1x4x256xf32>
    %20 = arith.mulf %19, %16 : vector<1x4x256xf32>
    %21 = vector.broadcast %18 : vector<1x4x1xf32> to vector<1x4x256xf32>
    %22 = arith.addf %20, %21 : vector<1x4x256xf32>
    %c0_12 = arith.constant 0 : index
    %c0_13 = arith.constant 0 : index
    %c0_14 = arith.constant 0 : index
    %23 = vector.load %arg5[%c0_12, %c0_13, %c0_14] : memref<1x4x256xf32, #tpu.memory_space<vmem>>, vector<1x4x256xf32>
    tpu.vector_store %arg5[%c0_12, %c0_13, %c0_14], %22 {strides = array<i32>} : memref<1x4x256xf32, #tpu.memory_space<vmem>>, vector<1x4x256xf32>,
    return
  }
  func.func @transform_0(%arg0: i32, %arg1: i32) -> (i32, i32, i32) {
    %c0_i32 = arith.constant 0 : i32
    %c0_i32_0 = arith.constant 0 : i32
    return %arg0, %c0_i32, %arg1 : i32, i32, i32
  }
  func.func @transform_1(%arg0: i32, %arg1: i32) -> (i32, i32, i32) {
    %c0_i32 = arith.constant 0 : i32
    %c0_i32_0 = arith.constant 0 : i32
    %c0_i32_1 = arith.constant 0 : i32
    %c0_i32_2 = arith.constant 0 : i32
    return %c0_i32, %c0_i32_0, %c0_i32_1 : i32, i32, i32
  }
  func.func @transform_2(%arg0: i32, %arg1: i32) -> (i32, i32, i32) {
    %c0_i32 = arith.constant 0 : i32
    %c0_i32_0 = arith.constant 0 : i32
    %c0_i32_1 = arith.constant 0 : i32
    %c0_i32_2 = arith.constant 0 : i32
    return %c0_i32, %c0_i32_0, %c0_i32_1 : i32, i32, i32
  }
  func.func @transform_3(%arg0: i32, %arg1: i32) -> (i32, i32, i32) {
    %c0_i32 = arith.constant 0 : i32
    %c0_i32_0 = arith.constant 0 : i32
    return %arg0, %c0_i32, %arg1 : i32, i32, i32
  }
}

</mosaic_0001>

<bundles_post_ra>
// kernel: tpu_custom_call.1
= control target key start
LH: loop header
LB: loop body
LE: loop exit
PB: predicated region body
PF: predicated region fallthrough
CT: control target
= control target key end

     0   :  { %8 = vsyncpa [#allocation3], 0  ;;  %s797_s0 = inlined_call_operand.hbm [shape: f32[2,4,256], index: 0, kind: input, shape index: {}]   ;;  %s798_s1 = inlined_call_operand.vmem [shape: f32[1,4,1], index: 1, kind: input, shape index: {}]   ;;  %s799_s2 = inlined_call_operand.vmem [shape: f32[1,4,1], index: 2, kind: input, shape index: {}]   ;;  %s800_s3 = inlined_call_operand.hbm [shape: f32[2,4,256], index: 3, kind: output, shape index: {}]  }
   0x1   :  { %10 = vsyncpa [#allocation3 + $0x1], 0 }
   0x2   :  { %11 = vsyncpa [#allocation4], 0 }
   0x3   :  { %13 = vsyncpa [#allocation4 + $0x1], 0  ;;  %s611_s12 = smov 0   ;;  %s613_s13 = smov 0  }
   0x4   :  { %s615_s14 = smov 0   ;;  %s617_s15 = smov 0  }
   0x5   :  { %s619_s16 = smov 0   ;;  %s621_s17 = smov 0  }
   0x6 LB: > { %s388_s18 = sadd.s32 4294967295, %s586_s17   ;;  %s389_s19 = sadd.s32 4294967294, %s586_s17   ;;  %s586_s17 = sphi %s621_s17, %s19_s17   ;;  %s582_s16 = sphi %s619_s16, %s816_s16   ;;  %s578_s15 = sphi %s617_s15, %s815_s15   ;;  %s574_s14 = sphi %s615_s14, %s814_s14   ;;  %s570_s13 = sphi %s613_s13, %s813_s13   ;;  %s566_s12 = sphi %s611_s12, %s812_s12  }
   0x7   : > { %s31_s20 = sadd.s32 1, %s582_s16  ;;  %s40_s21 = sadd.s32 1, %s574_s14 }
   0x8   : > { %p33_p0 = scmp.ge.s32.totalorder %s31_s20, 2  ;;  %p47_p1 = scmp.ne.s32.totalorder %s574_s14, %s570_s13 }
   0x9   : > { %p48_p2 = scmp.eq.s32.totalorder %s586_s17, 0  ;;  %p53_p3 = scmp.ne.s32.totalorder %s570_s13, %s566_s12 }
   0xa   : > { %s818_s20 = smov (%p33_p0, %s31_s20), 0  ;;  %p54_p5 = scmp.eq.s32.totalorder %s388_s18, 0 }
   0xb   : > { %p652_p4 = por %p48_p2, %p47_p1  ;;  %s35_s23 = ssub.s32 %s582_s16, %s818_s20 }
   0xc   : > { %p121_p6 = scmp.eq.s32.totalorder %s388_s18, 1  ;;  %p38_p7 = scmp.eq.s32.totalorder %s35_s23, 0 }
   0xd   : > { %p658_p8 = por %p54_p5, %p53_p3  ;;  %p127_p10 = scmp.eq.s32.totalorder %s389_s19, 1 }
   0xe   : > { %p662_p9 = por %p121_p6, %p47_p1  ;;  %p417_p13 = scmp.lt.s32.totalorder %s586_s17, 2 }
   0xf   : > { %s667_s26 = scalar_select %p38_p7, %s574_s14, %s40_s21  }
  0x10   : > { %s804_s25 = scalar_select %p662_p9, 1, 0 }
  0x11   : > { %p669_p11 = por %p127_p10, %p53_p3  ;;  %s153_s28 = sand.u32 1, %s574_s14  }
  0x12   : > { %s392_s29 = sshll.u32 %s153_s28, 3  ;;  %s403_s30 = sshll.u32 %s582_s16, 7 }
  0x13   : > { %s805_s27 = scalar_select %p669_p11, 1, 0 }
  0x14   : > { %s680_s6 = scalar_lea.hbm %s797_s0, %s403_s30  ;;  %s157_s7 = scalar_lea.vmem [#allocation2], %s392_s29 }
  0x15   : > { %s167_s8 = sshll.u32 %s157_s7, 4  ;;  %p686_p0 = pnand %p417_p13, %p652_p4  ;;  %s682_s8 = int_to_ptr.vmem [resolvable:$true] %s167_s8 }
  0x16   : > { %s154_s10 = scalar_lea.sflag [#allocation3], %s153_s28  ;;  %s474_s11 = scalar_lea.hbm %s680_s6, 128 }
  0x17   : > { %p475_p3 = scmp.ne.s32.totalorder %s680_s6, %s474_s11  ;;  %p476_p5 = pneg %p686_p0 }
  0x18   : > { %s479_s21 = scalar_lea.hbm %s797_s0, 256  ;;  %p480_p4 = scmp.lt.u32.totalorder %s680_s6, %s797_s0 }
  0x19   : > { %p477_p6 = pnand %p476_p5, %p475_p3  ;;  %p481_p10 = scmp.lt.u32.totalorder %s479_s21, %s474_s11 }
  0x1a   : > { %p483_p12 = scmp.lt.u32.totalorder %s474_s11, %s680_s6 }
  0x1b   : > { %p478_p7 = pneg %p477_p6  ;;  %p482_p13 = por %p481_p10, %p480_p4 }
  0x1d   : > { %p484_p1 = por %p483_p12, %p482_p13 }
  0x1f   : > { %p485_p2 = pnand %p484_p1, %p478_p7 }
  0x21   : > { %488 = shalt.err (!%p485_p2)
}
  0x22   : > { %s489_s28 = scalar_lea.vmem %s682_s8, 128  ;;  %s588_s29 = smov [#allocation2]  }
  0x23   : > { %p490_p3 = scmp.ne.s32.totalorder %s682_s8, %s489_s28  ;;  %s494_s30 = sshll.u32 %s588_s29, 4  ;;  %s495_s30 = int_to_ptr.vmem [resolvable:$false] %s494_s30 }
  0x24   : > { %s496_s4 = scalar_lea.vmem %s495_s30, 256  ;;  %p497_p9 = scmp.lt.s32.totalorder %s682_s8, %s495_s30 }
  0x25   : > { %p492_p6 = pnand %p490_p3, %p476_p5  ;;  %p498_p4 = scmp.lt.s32.totalorder %s496_s4, %s489_s28 }
  0x27   : > { %p493_p11 = pneg %p492_p6  ;;  %p499_p10 = por %p498_p4, %p497_p9 }
  0x29   : > { %p500_p12 = pnand %p499_p10, %p493_p11 }
  0x2b   : > { %503 = shalt.err (!%p500_p12)
}
  0x2c   : > { %412 = dma.hbm_to_vmem [thread:$0]  (!%p686_p0), %s680_s6, 128, %s682_s8, %s154_s10  }
  0x2d   : > { %p807_p1 = scmp.lt.s32.totalorder %s586_s17, 3  ;;  %p808_p2 = scmp.ge.s32.totalorder %s586_s17, 1 }
  0x2f   : > { %p173_p5 = pnand %p808_p2, %p807_p1 }
  0x30   : > { %s722_s5 = sand.u32 (!%p173_p5), 1, %s570_s13  }
  0x31   : > { %176 = sbr.rel (%p173_p5) target bundleno = 209 (0xd1), region = 32  ;;  %s396_s7 = sshll.u32 (!%p173_p5), %s722_s5, 3 }
  0x32   : > { %s179_s11 = scalar_lea.sflag (!%p173_p5), [#allocation3], %s722_s5  ;;  %s182_s9 = scalar_lea.vmem (!%p173_p5), [#allocation2], %s396_s7 }
  0x38   : > { %557 = dma.done.wait (%p658_p8), %s179_s11, 128  }
  0x39   : > { %559 = vsyncadd (%p658_p8), %s179_s11, 4294967168  ;;  %v589_v0 = vmov 0   ;;  %v263_v1 = vld [vmem:[%s798_s1] sm:$0xf]  ;;  %vm211_vm0 = vcmask 1043456   ;;  %s404_s24 = sshll.u32 %s578_s15, 7 }
  0x3a   : > { %468 = vset.pattern.permute.xlu0 %v589_v0  ;;  %v264_v2 = vld [vmem:[%s799_s2] sm:$0xf]  ;;  %s204_s19 = scalar_lea.vmem [#allocation5], %s396_s7  ;;  %s748_s28 = scalar_lea.hbm %s800_s3, %s404_s24 }
  0x3b   : > { %267 = vperm.xlu0 %468, %v263_v1   ;;  %v207_v3 = vld [vmem:[%s182_s9] sm:$0xff]  ;;  %s304_s21 = sshll.u32 %s204_s19, 4  ;;  %s288_s29 = scalar_lea.sflag [#allocation4], %s722_s5  ;;  %s750_s21 = int_to_ptr.vmem [resolvable:$true] %s304_s21 }
  0x3c   : > { %v209_v4 = vcombine.high %v207_v3, %v207_v3  ;;  %v212_v5 = vsel %vm211_vm0, %v207_v3, 0.0  ;;  %s504_s30 = scalar_lea.vmem %s750_s21, 128  ;;  %p809_p9 = scmp.ne.s32.totalorder %s804_s25, 0 }
  0x3d   : > { %v213_v7 = vrot.slane %v212_v5, 4  ;;  %p505_p8 = scmp.ne.s32.totalorder %s750_s21, %s504_s30  ;;  %s590_s15 = smov [#allocation5]  }
  0x3e   : > { %v219_v6 = vsel %vm211_vm0, %v209_v4, 0.0  ;;  %s508_s4 = sshll.u32 %s590_s15, 4  ;;  %s509_s4 = int_to_ptr.vmem [resolvable:$false] %s508_s4 }
  0x3f   : > { %277 = vperm.xlu0 %468, %v264_v2   ;;  %v220_v8 = vrot.slane %v219_v6, 4  ;;  %v214_v9 = vadd.f32 %v213_v7, %v212_v5  ;;  %p506_p11 = pnand %p505_p8, %p809_p9  ;;  %s510_s7 = scalar_lea.vmem %s509_s4, 256 }
  0x40   : > { %p511_p7 = scmp.lt.s32.totalorder %s750_s21, %s509_s4  ;;  %p512_p13 = scmp.lt.s32.totalorder %s510_s7, %s504_s30 }
  0x41   : > { %v221_v10 = vadd.f32 %v220_v8, %v219_v6  ;;  %v215_v11 = vrot.slane %v214_v9, 2  ;;  %p507_p0 = pneg %p506_p11 }
  0x42   : > { %p513_p3 = por %p512_p13, %p511_p7 }
  0x43   : > { %v222_v12 = vrot.slane %v221_v10, 2  ;;  %v216_v13 = vadd.f32 %v215_v11, %v214_v9 }
  0x44   : > { %p514_p6 = pnand %p513_p3, %p507_p0 }
  0x45   : > { %v223_v14 = vadd.f32 %v222_v12, %v221_v10  ;;  %v217_v15 = vrot.slane %v216_v13, 1 }
  0x47   : > { %v224_v16 = vrot.slane %v223_v14, 1  ;;  %v218_v17 = vadd.f32 %v217_v15, %v216_v13 }
  0x49   : > { %v225_v18 = vadd.f32 %v224_v16, %v223_v14  ;;  %v227_v19 = vmul.f32 0.25, %v218_v17 }
  0x4b   : > { %v228_v20 = vmul.f32 0.25, %v225_v18 }
  0x4d   : > { %v231_v21 = vcombine.low %v227_v19, %v228_v20 }
  0x4f   : > { %v233_v22 = vsub.f32 %v207_v3, %v231_v21 }
  0x51   : > { %v234_v23 = vmul.f32 %v233_v22, %v233_v22 }
  0x53   : > { %v236_v24 = vcombine.high %v234_v23, %v234_v23  ;;  %v238_v25 = vsel %vm211_vm0, %v234_v23, 0.0 }
  0x54   : > { %v239_v27 = vrot.slane %v238_v25, 4 }
  0x55   : > { %v245_v26 = vsel %vm211_vm0, %v236_v24, 0.0 }
  0x56   : > { %v246_v28 = vrot.slane %v245_v26, 4  ;;  %v240_v29 = vadd.f32 %v239_v27, %v238_v25 }
  0x58   : > { %v247_v30 = vadd.f32 %v246_v28, %v245_v26  ;;  %v241_v31 = vrot.slane %v240_v29, 2 }
  0x5a   : > { %v248_v32 = vrot.slane %v247_v30, 2  ;;  %v242_v33 = vadd.f32 %v241_v31, %v240_v29 }
  0x5c   : > { %v249_v34 = vadd.f32 %v248_v32, %v247_v30  ;;  %v243_v35 = vrot.slane %v242_v33, 1 }
  0x5e   : > { %v250_v36 = vrot.slane %v249_v34, 1  ;;  %v244_v37 = vadd.f32 %v243_v35, %v242_v33 }
  0x60   : > { %v251_v38 = vadd.f32 %v250_v36, %v249_v34  ;;  %v252_v39 = vmul.f32 0.25, %v244_v37 }
  0x62   : > { %v253_v40 = vmul.f32 0.25, %v251_v38  ;;  %v254_v41 = vadd.f32 1e-06, %v252_v39 }
  0x64   : > { %v255_v42 = vadd.f32 1e-06, %v253_v40  ;;  %470 = vrsqrt.f32 %v254_v41 }
  0x66   : > { %472 = vrsqrt.f32 %v255_v42 }
  0x6e   : > { %v471_v43 = vpop.eup %470 }
  0x70   : > { %v473_v44 = vpop.eup %472 }
  0x71   : > { %v260_v45 = vcombine.low %v471_v43, %v473_v44 }
  0x73   : > { %v262_v46 = vmul.f32 %v260_v45, %v233_v22 }
  0x75   : > { %v271_v47 = vcombine.high %v262_v46, %v262_v46 }
  0xba   : > { %v268_v48 = vpop.permute.xlu0 %267 }
  0xbb   : > { %v273_v49 = vmul.f32 %v268_v48, %v262_v46  ;;  %v274_v50 = vmul.f32 %v271_v47, %v268_v48 }
  0xbe   : > { %v278_v51 = vpop.permute.xlu0 %277 }
  0xbf   : > { %v280_v52 = vadd.f32 %v278_v51, %v273_v49  ;;  %v281_v53 = vadd.f32 %v278_v51, %v274_v50 }
  0xc1   : > { %v284_v54 = vcombine.low %v280_v52, %v281_v53 }
  0xc3   : > { %286 = vst [vmem:[%s204_s19] sm:$0xff] %v284_v54 }
  0xc4   : > { %517 = shalt.err (!%p514_p6)
}
  0xc5   : > { %s518_s5 = scalar_lea.hbm %s748_s28, 128  ;;  %s522_s6 = scalar_lea.hbm %s800_s3, 256 }
  0xc6   : > { %p519_p4 = scmp.ne.s32.totalorder %s748_s28, %s518_s5  ;;  %p523_p1 = scmp.lt.u32.totalorder %s748_s28, %s800_s3 }
  0xc7   : > { %p524_p2 = scmp.lt.u32.totalorder %s522_s6, %s518_s5  ;;  %p526_p8 = scmp.lt.u32.totalorder %s518_s5, %s748_s28 }
  0xc8   : > { %p520_p10 = pnand %p519_p4, %p809_p9 }
  0xc9   : > { %p525_p5 = por %p524_p2, %p523_p1 }
  0xca   : > { %p521_p12 = pneg %p520_p10 }
  0xcb   : > { %p527_p11 = por %p526_p8, %p525_p5 }
  0xcd   : > { %p528_p0 = pnand %p527_p11, %p521_p12 }
  0xcf   : > { %531 = shalt.err (!%p528_p0)
}
  0xd0   : > { %407 = dma.vmem_to_hbm [thread:$0]  (%p809_p9), %s750_s21, 128, %s748_s28, %s288_s29  }
  0xd1 PF: > { %s316_s18 = sand.u32 1, %s566_s12   ;;  %p810_p7 = scmp.ne.s32.totalorder %s805_s27, 0 }
  0xd2   : > { %p811_p13 = scmp.ge.s32.totalorder %s586_s17, 2  ;;  %s317_s24 = scalar_lea.sflag [#allocation4], %s316_s18 }
  0xd4   : > { %p414_p3 = pnand %p811_p13, %p810_p7 }
  0xd6   : > { %561 = dma.done.wait (!%p414_p3), %s317_s24, 128  }
  0xd7   : > { %563 = vsyncadd (!%p414_p3), %s317_s24, 4294967168  ;;  %s19_s17 = sadd.s32 1, %s586_s17   ;;  %s812_s12 = smov %s570_s13 }
  0xd8   : > { %p16_p6 = scmp.ge.s32.totalorder %s19_s17, 4   ;;  %s813_s13 = smov %s574_s14 }
  0xd9   : > { %s814_s14 = smov %s667_s26  ;;  %s815_s15 = smov %s582_s16 }
  0xda   : > { %s816_s16 = smov %s818_s20  ;;  %18 = sbr.rel (!%p16_p6) target bundleno = 6 (0x6), region = 77 }
  0xe1   :  { %322 = vsyncpa [#allocation3], 1 }
  0xe2   :  { %324 = vsyncpa [#allocation3 + $0x1], 1 }
  0xe3   :  { %325 = vsyncpa [#allocation4], 1 }
  0xe4   :  { %327 = vsyncpa [#allocation4 + $0x1], 1 }

</bundles_post_ra>
